<compile_context>
chip_gen: v6e
topology: v6e:2x2x1
jax: 0.10.0
libtpu: 0.0.40
codegen_flags: <defaults>
</compile_context>

<pallas_src>
import functools
import math

import jax
import jax.numpy as jnp
import numpy as np
from jax.experimental import pallas as pl
from jax.experimental.pallas import tpu as pltpu

H = 768          # roberta / tree hidden size (fixed by Tree_Embedding.__init__)
P = 1024         # projection size == flan-t5-large d_model
NUM_REL = 10     # W_conjunction .. W_causal
VOCAB = 64       # small synthetic vocab for the embedding tables


# ----------------------------- Pallas kernels ------------------------------

def _masked_mean_pool_kernel(x_ref, m_ref, o_ref):
    x = x_ref[...]                                   # (B, L, H) f32
    m = m_ref[...]                                   # (B, L)    f32
    summed = jnp.sum(x * m[:, :, None], axis=1)      # (B, H)
    # guard against all-zero mask rows; exact divide (no approx reciprocal)
    denom = jnp.maximum(jnp.sum(m, axis=1, keepdims=True), 1.0)
    o_ref[...] = summed / denom


def masked_mean_pool(token_emb, attention_mask):
    B, _, Hh = token_emb.shape
    return pl.pallas_call(
        _masked_mean_pool_kernel,
        out_shape=jax.ShapeDtypeStruct((B, Hh), jnp.float32),
        in_specs=[pl.BlockSpec(memory_space=pltpu.MemorySpace.VMEM),
                  pl.BlockSpec(memory_space=pltpu.MemorySpace.VMEM)],
        out_specs=pl.BlockSpec(memory_space=pltpu.MemorySpace.VMEM),
    )(token_emb.astype(jnp.float32), attention_mask.astype(jnp.float32))


def _fused_projection_kernel(x_ref, w1_ref, b1_ref, w2_ref, b2_ref, o_ref):
    h = jnp.dot(x_ref[...].astype(jnp.bfloat16), w1_ref[...],
                preferred_element_type=jnp.float32) + b1_ref[...]
    o_ref[...] = jnp.dot(h.astype(jnp.bfloat16), w2_ref[...],
                         preferred_element_type=jnp.float32) + b2_ref[...]


def fused_projection(x, w1, b1, w2, b2):
    """projection_layer_2(projection_layer_1(x)) — fallback path only."""
    M = x.shape[0]
    N = w2.shape[1]
    flops = 2 * M * (w1.shape[0] * w1.shape[1] + w2.shape[0] * w2.shape[1])
    bytes_accessed = 2 * (w1.size + w2.size) + 4 * (x.size + b1.size + b2.size + M * N)
    return pl.pallas_call(
        _fused_projection_kernel,
        out_shape=jax.ShapeDtypeStruct((M, N), jnp.float32),
        in_specs=[pl.BlockSpec(memory_space=pltpu.MemorySpace.VMEM)] * 5,
        out_specs=pl.BlockSpec(memory_space=pltpu.MemorySpace.VMEM),
        cost_estimate=pl.CostEstimate(flops=int(flops), transcendentals=0,
                                      bytes_accessed=int(bytes_accessed)),
    )(x, w1, b1, w2, b2)


def _tree_chain_kernel(isf_ref, isl_ref, srow_ref, rel_ref,     # scalar prefetch
                       la_ref, kw_ref, ra_ref, sent_ref, zm_ref,  # resident VMEM
                       relw_ref, relb_ref, ttw_ref, ttb_ref,    # tree weights
                       p1w_ref, p1b_ref, p2w_ref, p2b_ref,      # projection weights
                       o_ref,                                   # (1, P) final output
                       st_ref, acc_ref,                         # carried state
                       *, inv_num_sents):
    k = pl.program_id(0)

    @pl.when(k == 0)
    def _init():
        acc_ref[...] = jnp.zeros_like(acc_ref)
        st_ref[...] = jnp.zeros_like(st_ref)

    la = la_ref[pl.ds(k, 1), :]                      # (1, H)
    kw = kw_ref[pl.ds(k, 1), :]
    ra = ra_ref[pl.ds(k, 1), :]
    ttw = ttw_ref[...]                               # (2H, H) bf16, resident
    ttb = ttb_ref[...]                               # (1, H)  f32

    first = isf_ref[k] == 1
    # explicitly zero the carried subtree state at the start of a sentence so
    # the recurrence never consumes a stale value from the previous sentence.
    prev_st = jnp.where(first, jnp.zeros_like(st_ref[...]), st_ref[...])

    # right_argument_combine = W_text_tree([ra ; prev_st])  (only if not first)
    ra_comb = jnp.dot(
        jnp.concatenate([ra, prev_st], axis=1).astype(jnp.bfloat16),
        ttw, preferred_element_type=jnp.float32) + ttb
    ra_used = jnp.where(first, ra, ra_comb)

    # relation-dispatched linear: weight block selected via scalar prefetch
    concat = jnp.concatenate([la, kw, ra_used], axis=1)          # (1, 3H)
    st = jnp.dot(concat.astype(jnp.bfloat16), relw_ref[...],
                 preferred_element_type=jnp.float32) + relb_ref[...]
    st_ref[...] = st

    # last relation of a sentence: tree_acc += W_text_tree([sent_emb ; st])
    @pl.when(isl_ref[k] == 1)
    def _finish_sentence():
        sent = sent_ref[pl.ds(srow_ref[k], 1), :]
        contrib = jnp.dot(
            jnp.concatenate([sent, st], axis=1).astype(jnp.bfloat16),
            ttw, preferred_element_type=jnp.float32) + ttb
        acc_ref[...] = acc_ref[...] + contrib

    # final step: add zero-relation sentences, scale by 1/num_sents and run
    # both projection layers — all without leaving VMEM.
    @pl.when(k == pl.num_programs(0) - 1)
    def _finalize():
        zero_contrib = jnp.sum(sent_ref[...] * zm_ref[...], axis=0, keepdims=True)
        tree = (acc_ref[...] + zero_contrib) * inv_num_sents     # (1, H)
        h = jnp.dot(tree.astype(jnp.bfloat16), p1w_ref[...],
                    preferred_element_type=jnp.float32) + p1b_ref[...]
        o_ref[...] = jnp.dot(h.astype(jnp.bfloat16), p2w_ref[...],
                             preferred_element_type=jnp.float32) + p2b_ref[...]


def tree_relation_chain(la_emb, kw_emb, ra_emb, sent_emb, zmask,
                        rel_w, rel_b, tt_w, tt_b,
                        p1w, p1b, p2w, p2b,
                        is_first, is_last, sent_row, rel_idx, *, num_sents):
    """Fused relation recurrence + sentence accumulation + final projection."""
    total_rel = la_emb.shape[0]
    rel_idx = jnp.clip(rel_idx.astype(jnp.int32), 1, NUM_REL)   # bounds guard

    def const2(k, isf, isl, srow, rel):
        return (0, 0)

    def rel_map(k, isf, isl, srow, rel):
        return (rel[k] - 1, 0, 0)

    grid_spec = pltpu.PrefetchScalarGridSpec(
        num_scalar_prefetch=4,
        grid=(total_rel,),
        in_specs=[
            pl.BlockSpec(la_emb.shape, const2),
            pl.BlockSpec(kw_emb.shape, const2),
            pl.BlockSpec(ra_emb.shape, const2),
            pl.BlockSpec(sent_emb.shape, const2),
            pl.BlockSpec(zmask.shape, const2),
            # relation weight block: leading dim squeezed, index from prefetch
            pl.BlockSpec((None, 3 * H, H), rel_map),
            pl.BlockSpec((None, 1, H), rel_map),
            pl.BlockSpec((2 * H, H), const2),
            pl.BlockSpec((1, H), const2),
            pl.BlockSpec((H, P), const2),
            pl.BlockSpec((1, P), const2),
            pl.BlockSpec((P, P), const2),
            pl.BlockSpec((1, P), const2),
        ],
        out_specs=pl.BlockSpec((1, P), const2),
        scratch_shapes=[pltpu.VMEM((1, H), jnp.float32),   # st (subtree state)
                        pltpu.VMEM((1, H), jnp.float32)],  # tree accumulator
    )
    flops = (2 * total_rel * (3 * H * H + (2 * H) * H)
             + 2 * num_sents * (2 * H) * H
             + 2 * (H * P + P * P))
    bytes_accessed = (total_rel * 3 * H * H * 2            # streamed rel blocks (bf16)
                      + 2 * H * H * 2 + H * P * 2 + P * P * 2   # resident weights
                      + 4 * (la_emb.size + kw_emb.size + ra_emb.size
                             + sent_emb.size + P))
    kernel = functools.partial(_tree_chain_kernel,
                               inv_num_sents=1.0 / float(num_sents))
    return pl.pallas_call(
        kernel,
        out_shape=jax.ShapeDtypeStruct((1, P), jnp.float32),
        grid_spec=grid_spec,
        compiler_params=pltpu.CompilerParams(
            dimension_semantics=("arbitrary",),            # serial carry over `st`
            vmem_limit_bytes=32 * 1024 * 1024),
        cost_estimate=pl.CostEstimate(flops=int(flops), transcendentals=0,
                                      bytes_accessed=int(bytes_accessed)),
    )(is_first, is_last, sent_row, rel_idx,
      la_emb, kw_emb, ra_emb, sent_emb, zmask,
      rel_w, rel_b, tt_w, tt_b, p1w, p1b, p2w, p2b)


# ------------------------------- parameters --------------------------------

def xavier_uniform(key, fan_in, fan_out):
    bound = math.sqrt(6.0 / (fan_in + fan_out))
    return jax.random.uniform(key, (fan_in, fan_out), jnp.float32, -bound, bound)


def init_params(key):
    ks = jax.random.split(key, 8)
    p = {}
    # TODO(synk): RoBERTa / T5 pretrained weights replaced by deterministic tables.
    p["roberta_embed"] = 0.02 * jax.random.normal(ks[0], (VOCAB, H), jnp.float32)
    p["t5_shared"] = 0.02 * jax.random.normal(ks[1], (VOCAB, P), jnp.float32)
    # matmul weights stored bf16 (memory-bound at M=1); biases kept f32
    p["proj1_w"] = xavier_uniform(ks[2], H, P).astype(jnp.bfloat16)
    p["proj1_b"] = jnp.zeros((1, P), jnp.float32)
    p["proj2_w"] = xavier_uniform(ks[3], P, P).astype(jnp.bfloat16)
    p["proj2_b"] = jnp.zeros((1, P), jnp.float32)
    p["text_tree_w"] = xavier_uniform(ks[4], 2 * H, H).astype(jnp.bfloat16)
    p["text_tree_b"] = jnp.zeros((1, H), jnp.float32)
    rel_keys = jax.random.split(ks[5], NUM_REL)
    p["rel_w"] = jnp.stack([xavier_uniform(k, 3 * H, H) for k in rel_keys],
                           0).astype(jnp.bfloat16)
    p["rel_b"] = jnp.zeros((NUM_REL, 1, H), jnp.float32)
    return p


# ------------------------------ model forward ------------------------------

def token_embedding(p, ids):
    # TODO(synk): full RoBERTa encoder modeled as a deterministic embedding lookup.
    return p["roberta_embed"][ids]                  # (B, L, H)


def pooled_embeddings(p, groups):
    """Batch all masked-mean-pool calls into one pallas_call, then split."""
    toks = jnp.concatenate([token_embedding(p, ids) for ids, _ in groups], axis=0)
    masks = jnp.concatenate([m for _, m in groups], axis=0)
    pooled = masked_mean_pool(toks, masks)
    out, off = [], 0
    for ids, _ in groups:
        n = ids.shape[0]
        out.append(pooled[off:off + n])
        off += n
    return out


def tree_forward(p, kw_ids, kw_mask, la_ids, la_mask, ra_ids, ra_mask,
                 sent_ids, sent_mask, num_rel_each_sent, index_logical_relation):
    """Mirrors Tree_Embedding.forward. num_rel_each_sent is host-side (.item())."""
    if sent_ids.shape[0] == 0:
        return fused_projection(jnp.zeros((1, H), jnp.float32),
                                p["proj1_w"], p["proj1_b"],
                                p["proj2_w"], p["proj2_b"])

    if kw_ids.shape[0] != 0:
        sent_emb, kw_emb, la_emb, ra_emb = pooled_embeddings(
            p, [(sent_ids, sent_mask), (kw_ids, kw_mask),
                (la_ids, la_mask), (ra_ids, ra_mask)])
    else:
        (sent_emb,) = pooled_embeddings(p, [(sent_ids, sent_mask)])
    num_sents = sent_emb.shape[0]

    total_rel = int(sum(int(n) for n in num_rel_each_sent)) \
        if kw_ids.shape[0] != 0 else 0

    if kw_ids.shape[0] != 0 and total_rel > 0:
        # host-side per-step metadata (analog of the .item() loops in PyTorch)
        is_first, is_last, sent_row, zmask = [], [], [], []
        for si, n_rel in enumerate(num_rel_each_sent):
            n_rel = int(n_rel)
            zmask.append([1.0 if n_rel == 0 else 0.0])
            for j in range(n_rel):
                is_first.append(1 if j == 0 else 0)
                is_last.append(1 if j == n_rel - 1 else 0)
                sent_row.append(si)
        rel_np = np.asarray(jax.device_get(index_logical_relation)).astype(np.int64)
        assert rel_np.min() >= 1 and rel_np.max() <= NUM_REL, \
            "index_logical_relation out of range [1, 10]"
        # single fused kernel: chain + sentence accum + /num_sents + projection
        return tree_relation_chain(
            la_emb, kw_emb, ra_emb, sent_emb,
            jnp.asarray(zmask, jnp.float32),
            p["rel_w"], p["rel_b"], p["text_tree_w"], p["text_tree_b"],
            p["proj1_w"], p["proj1_b"], p["proj2_w"], p["proj2_b"],
            jnp.asarray(is_first, jnp.int32),
            jnp.asarray(is_last, jnp.int32),
            jnp.asarray(sent_row, jnp.int32),
            index_logical_relation.astype(jnp.int32),
            num_sents=num_sents)

    # fallback: no logical relations — mean of sentence embeddings then projection
    tree_emb = jnp.sum(sent_emb, axis=0, keepdims=True) / num_sents
    return fused_projection(tree_emb, p["proj1_w"], p["proj1_b"],
                            p["proj2_w"], p["proj2_b"])


def model_forward(p, source_input_ids, target_input_ids, t5_soft_token,
                  kw_ids, kw_mask, la_ids, la_mask, ra_ids, ra_mask,
                  sent_ids, sent_mask, num_rel_each_sent,
                  index_logical_relation, inference_mode):
    tree_emb = tree_forward(p, kw_ids, kw_mask, la_ids, la_mask, ra_ids,
                            ra_mask, sent_ids, sent_mask, num_rel_each_sent,
                            index_logical_relation)
    tree_emb3 = tree_emb[None, :, :]                  # (1, 1, 1024)
    src_emb = p["t5_shared"][source_input_ids]        # (1, S, 1024)
    t = int(t5_soft_token)                            # analog of .item()
    new_src = jnp.concatenate(
        [src_emb[:, :t, :], tree_emb3, src_emb[:, t:, :]], axis=1)
    # TODO(synk): flan-t5-large encoder/decoder forward + generate()/loss are
    # not translatable to a single Pallas kernel; return assembled inputs_embeds.
    return new_src, tree_emb


# ----------------------------- pure-JAX reference ---------------------------

def _ref_linear(x, w_bf16, b_f32):
    return jnp.dot(x.astype(jnp.bfloat16), w_bf16,
                   preferred_element_type=jnp.float32) + b_f32


def _ref_pool(tok, mask):
    m = mask.astype(jnp.float32)
    s = jnp.sum(tok * m[:, :, None], axis=1)
    d = jnp.maximum(jnp.sum(m, axis=1, keepdims=True), 1.0)
    return s / d


def tree_forward_ref(p, kw_ids, kw_mask, la_ids, la_mask, ra_ids, ra_mask,
                     sent_ids, sent_mask, num_rel_each_sent, index_rel):
    tree_emb = jnp.zeros((1, H), jnp.float32)
    if sent_ids.shape[0] != 0:
        sent_emb = _ref_pool(token_embedding(p, sent_ids), sent_mask)
        num_sents = sent_emb.shape[0]
        if kw_ids.shape[0] != 0:
            kw_emb = _ref_pool(token_embedding(p, kw_ids), kw_mask)
            la_emb = _ref_pool(token_embedding(p, la_ids), la_mask)
            ra_emb = _ref_pool(token_embedding(p, ra_ids), ra_mask)
            idx = np.asarray(index_rel)
            start = 0
            for si in range(num_sents):
                n_rel = int(num_rel_each_sent[si])
                if n_rel != 0:
                    st = None
                    for j in range(n_rel):
                        k = start + j
                        if j == 0:
                            ra_used = ra_emb[k:k + 1]
                        else:
                            ra_used = _ref_linear(
                                jnp.concatenate([ra_emb[k:k + 1], st], 1),
                                p["text_tree_w"], p["text_tree_b"])
                        concat = jnp.concatenate(
                            [la_emb[k:k + 1], kw_emb[k:k + 1], ra_used], 1)
                        r = int(idx[k])
                        st = _ref_linear(concat, p["rel_w"][r - 1], p["rel_b"][r - 1])
                    tree_emb = tree_emb + _ref_linear(
                        jnp.concatenate([sent_emb[si:si + 1], st], 1),
                        p["text_tree_w"], p["text_tree_b"])
                else:
                    tree_emb = tree_emb + sent_emb[si:si + 1]
                start += n_rel
        else:
            tree_emb = tree_emb + jnp.sum(sent_emb, 0, keepdims=True)
        tree_emb = tree_emb / num_sents
    return _ref_linear(_ref_linear(tree_emb, p["proj1_w"], p["proj1_b"]),
                       p["proj2_w"], p["proj2_b"])


# ----------------------------------- main -----------------------------------

if __name__ == "__main__":
    key = jax.random.PRNGKey(0)
    p = init_params(key)

    # Small synthetic inputs: 2 sentences, 3 logical relations total ([2, 1]),
    # 8 tokens per sequence, source length 8, soft-token insertion position 3.
    ki = jax.random.split(jax.random.PRNGKey(0), 6)
    L = 8
    sent_ids = jax.random.randint(ki[0], (2, L), 0, VOCAB, dtype=jnp.int32)
    sent_mask = jnp.array([[1] * 8, [1] * 6 + [0] * 2], jnp.int32)
    kw_ids = jax.random.randint(ki[1], (3, L), 0, VOCAB, dtype=jnp.int32)
    kw_mask = jnp.array([[1] * 4 + [0] * 4] * 3, jnp.int32)
    la_ids = jax.random.randint(ki[2], (3, L), 0, VOCAB, dtype=jnp.int32)
    la_mask = jnp.array([[1] * 7 + [0]] * 3, jnp.int32)
    ra_ids = jax.random.randint(ki[3], (3, L), 0, VOCAB, dtype=jnp.int32)
    ra_mask = jnp.array([[1] * 5 + [0] * 3] * 3, jnp.int32)
    num_rel_each_sent = [2, 1]                         # host-side (.item() analog)
    index_logical_relation = jnp.array([1, 5, 3], jnp.int32)
    source_input_ids = jax.random.randint(ki[4], (1, 8), 0, VOCAB, dtype=jnp.int32)
    target_input_ids = jax.random.randint(ki[5], (1, 6), 0, VOCAB, dtype=jnp.int32)
    t5_soft_token = 3
    inference_mode = 0

    # --- correctness: batched masked mean pooling (exact divide) ---
    toks = jnp.concatenate([token_embedding(p, x) for x in
                            (sent_ids, kw_ids, la_ids, ra_ids)], axis=0)
    masks = jnp.concatenate([sent_mask, kw_mask, la_mask, ra_mask], axis=0)
    got_pool = masked_mean_pool(toks, masks)
    ref_pool = _ref_pool(toks, masks)
    np.testing.assert_allclose(np.asarray(got_pool), np.asarray(ref_pool),
                               rtol=1e-4, atol=1e-5)

    # --- correctness: fallback fused projection kernel ---
    x_test = got_pool[0:1, :H]
    ref_proj = _ref_linear(_ref_linear(x_test, p["proj1_w"], p["proj1_b"]),
                           p["proj2_w"], p["proj2_b"])
    got_proj = fused_projection(x_test, p["proj1_w"], p["proj1_b"],
                                p["proj2_w"], p["proj2_b"])
    np.testing.assert_allclose(np.asarray(got_proj), np.asarray(ref_proj),
                               rtol=5e-3, atol=5e-3)

    # --- correctness: full tree forward (fused chain + projection) vs pure JAX ---
    got_tree = tree_forward(p, kw_ids, kw_mask, la_ids, la_mask, ra_ids, ra_mask,
                            sent_ids, sent_mask, num_rel_each_sent,
                            index_logical_relation)
    ref_tree = tree_forward_ref(p, kw_ids, kw_mask, la_ids, la_mask, ra_ids,
                                ra_mask, sent_ids, sent_mask, num_rel_each_sent,
                                index_logical_relation)
    np.testing.assert_allclose(np.asarray(got_tree), np.asarray(ref_tree),
                               rtol=2e-2, atol=5e-3)

    # --- full forward ---
    new_src_embeds, tree_emb = model_forward(
        p, source_input_ids, target_input_ids, t5_soft_token,
        kw_ids, kw_mask, la_ids, la_mask, ra_ids, ra_mask,
        sent_ids, sent_mask, num_rel_each_sent, index_logical_relation,
        inference_mode)
    jax.block_until_ready((new_src_embeds, tree_emb))

    assert new_src_embeds.shape == (1, source_input_ids.shape[1] + 1, P)
    assert tree_emb.shape == (1, P)
    print("KERNEL_OK")
</pallas_src>

<mosaic_0001>
module attributes {stable_mosaic.version = 11 : i64} {
  func.func @_masked_mean_pool_kernel(%arg0: memref<11x8x768xf32, #tpu.memory_space<vmem>>, %arg1: memref<11x8xf32, #tpu.memory_space<vmem>>, %arg2: memref<11x768xf32, #tpu.memory_space<vmem>>) attributes {dimension_semantics = [], scalar_prefetch = 0 : i64, scratch_operands = 0 : i64, tpu.core_type = #tpu.core_type<tc>} {
    %c0 = arith.constant 0 : index
    %c0_0 = arith.constant 0 : index
    %c0_1 = arith.constant 0 : index
    %0 = vector.load %arg0[%c0, %c0_0, %c0_1] : memref<11x8x768xf32, #tpu.memory_space<vmem>>, vector<11x8x768xf32>
    %c0_2 = arith.constant 0 : index
    %c0_3 = arith.constant 0 : index
    %1 = vector.load %arg1[%c0_2, %c0_3] : memref<11x8xf32, #tpu.memory_space<vmem>>, vector<11x8xf32>
    %2 = vector.shape_cast %1 : vector<11x8xf32> to vector<11x8x1xf32>
    %3 = vector.broadcast %2 : vector<11x8x1xf32> to vector<11x8x768xf32>
    %4 = arith.mulf %0, %3 : vector<11x8x768xf32>
    %cst = arith.constant dense<0.000000e+00> : vector<11x768xf32>
    %5 = vector.multi_reduction <add>, %4, %cst [1] : vector<11x8x768xf32> to vector<11x768xf32>
    %cst_4 = arith.constant dense<0.000000e+00> : vector<11xf32>
    %6 = vector.multi_reduction <add>, %1, %cst_4 [1] : vector<11x8xf32> to vector<11xf32>
    %7 = vector.shape_cast %6 : vector<11xf32> to vector<11x1xf32>
    %cst_5 = arith.constant 1.000000e+00 : f32
    %8 = vector.broadcast %cst_5 : f32 to vector<11x1xf32>
    %9 = arith.maximumf %7, %8 : vector<11x1xf32>
    %10 = vector.broadcast %9 : vector<11x1xf32> to vector<11x768xf32>
    %11 = arith.divf %5, %10 : vector<11x768xf32>
    %c0_6 = arith.constant 0 : index
    %c0_7 = arith.constant 0 : index
    %12 = vector.load %arg2[%c0_6, %c0_7] : memref<11x768xf32, #tpu.memory_space<vmem>>, vector<11x768xf32>
    tpu.vector_store %arg2[%c0_6, %c0_7], %11 {strides = array<i32>} : memref<11x768xf32, #tpu.memory_space<vmem>>, vector<11x768xf32>,
    return
  }
}

</mosaic_0001>

<bundles_post_ra>
// kernel: tpu_custom_call.1
= control target key start
LH: loop header
LB: loop body
LE: loop exit
PB: predicated region body
PF: predicated region fallthrough
CT: control target
= control target key end

     0   :  { %7 = vsyncpa [#allocation3], 0  ;;  %s1495_s0 = inlined_call_operand.hbm [shape: f32[11,8,768], index: 0, kind: input, shape index: {}]   ;;  %s1496_s1 = inlined_call_operand.vmem [shape: f32[11,8], index: 1, kind: input, shape index: {}]   ;;  %s1497_s2 = inlined_call_operand.hbm [shape: f32[11,768], index: 2, kind: output, shape index: {}]  }
   0x1   :  { %8 = vsyncpa [#allocation4], 0  ;;  %s1034_s9 = smov [#allocation2]  }
   0x2   :  { %s14_s10 = sshll.u32 %s1034_s9, 4  ;;  %s15_s10 = int_to_ptr.vmem [resolvable:$true] %s14_s10 }
   0x3   :  { %s998_s11 = scalar_lea.vmem %s15_s10, 8448  ;;  %p1003_p1 = scmp.lt.s32.totalorder %s15_s10, %s15_s10 }
   0x4   :  { %p999_p0 = scmp.ne.s32.totalorder %s15_s10, %s998_s11  ;;  %p1004_p2 = scmp.lt.s32.totalorder %s998_s11, %s998_s11 }
   0x6   :  { %p1005_p3 = por %p1004_p2, %p1003_p1 }
   0x8   :  { %p1006_p4 = pnand %p1005_p3, %p999_p0 }
   0xa   :  { %1009 = shalt.err (!%p1006_p4)
}
   0xb   :  { %s1035_s12 = smov 768   ;;  %s1036_s13 = smov 48  }
   0xc   :  { %20 = dma.hbm_to_vmem [thread:$0]  %s1495_s0, 8448, %s15_s10, [#allocation3], %s1035_s12, %s1035_s12, %s1036_s13  }
   0xd   :  { %1030 = dma.done.wait [#allocation3], 8448  }
   0xe   :  { %1031 = vsyncadd [#allocation3], 4294958848  ;;  %v94_v0 = vlaneseq  ;;  %vm633_vm0 = vcmask 64512   ;;  %v92_v4 = vld [vmem:[%s1496_s1] sm:$0xff]  ;;  %v93_v5 = vld [vmem:[%s1496_s1 + $0x8] sm:$0x7] }
   0xf   :  { %vm637_vm1 = vcmask 59392   ;;  %v634_v6 = vsel %vm633_vm0, %v92_v4, 0.0  ;;  %v32_v25 = vld [vmem:[#allocation2 + $0x30] sm:$0xff]  ;;  %v33_v26 = vld [vmem:[#allocation2 + $0x38] sm:$0xff]  ;;  %v34_v27 = vld [vmem:[#allocation2 + $0x40] sm:$0xff]  ;;  %vm809_vm2 = vcmask 1041409  }
  0x10   :  { %v95_v1 = vshrl.u32 %v94_v0, 7  ;;  %635 = vadd.xlane.f32.xlu0 %v634_v6  ;;  %v638_v8 = vsel %vm637_vm1, %v93_v5, 0.0  ;;  %v35_v28 = vld [vmem:[#allocation2 + $0x48] sm:$0xff]  ;;  %v36_v29 = vld [vmem:[#allocation2 + $0x50] sm:$0xff]  ;;  %v37_v30 = vld [vmem:[#allocation2 + $0x58] sm:$0xff]  ;;  %vm812_vm3 = vcmask 1042434  }
  0x11   :  { %v38_v47 = vld [vmem:[#allocation2 + $0x60] sm:$0xff]  ;;  %v39_v48 = vld [vmem:[#allocation2 + $0x68] sm:$0xff]  ;;  %v40_v51 = vld [vmem:[#allocation2 + $0x70] sm:$0xff]  ;;  %vm815_vm4 = vcmask 1043459   ;;  %vm818_vm5 = vcmask 1044484   ;;  %vm821_vm6 = vcmask 1045509  }
  0x12   :  { %v103_v2 = vsub.s32 1, %v95_v1  ;;  %v110_v3 = vsub.s32 2, %v95_v1  ;;  %v117_v10 = vsub.s32 3, %v95_v1  ;;  %v124_v12 = vsub.s32 4, %v95_v1  ;;  %v41_v54 = vld [vmem:[#allocation2 + $0x78] sm:$0xff]  ;;  %v42_v55 = vld [vmem:[#allocation2 + $0x80] sm:$0xff] }
  0x13   :  { %v131_v14 = vsub.s32 5, %v95_v1  ;;  %v138_v16 = vsub.s32 6, %v95_v1  ;;  %v96_v18 = vsub.s32 0, %v95_v1  ;;  %v145_v20 = vsub.s32 7, %v95_v1  ;;  %v43_v56 = vld [vmem:[#allocation2 + $0x88] sm:$0xff]  ;;  %s1037_s0 = smov [#allocation5]  }
  0x14   :  { %v104_v7 = vrot.slane %v92_v4, %v103_v2  ;;  %v111_v9 = vrot.slane %v92_v4, %v110_v3  ;;  %639 = vadd.xlane.f32.xlu0 %v638_v8  ;;  %v118_v11 = vrot.slane %v92_v4, %v117_v10  ;;  %v125_v13 = vrot.slane %v92_v4, %v124_v12  ;;  %s952_s1 = sshll.u32 %s1037_s0, 4  ;;  %s953_s1 = int_to_ptr.vmem [resolvable:$true] %s952_s1 }
  0x15   :  { %v132_v15 = vrot.slane %v92_v4, %v131_v14  ;;  %v139_v17 = vrot.slane %v92_v4, %v138_v16  ;;  %v160_v19 = vrot.slane %v93_v5, %v103_v2  ;;  %v97_v21 = vrot.slane %v92_v4, %v96_v18  ;;  %s1010_s20 = scalar_lea.vmem %s953_s1, 1536  ;;  %p1015_p6 = scmp.lt.s32.totalorder %s953_s1, %s953_s1 }
  0x16   :  { %106 = vbcast.lane.b32.xlu1 %v104_v7, 256  ;;  %v146_v22 = vrot.slane %v92_v4, %v145_v20  ;;  %v167_v23 = vrot.slane %v93_v5, %v110_v3  ;;  %v153_v24 = vrot.slane %v93_v5, %v96_v18  ;;  %v44_v18 = vld [vmem:[#allocation2 + $0x90] sm:$0xff]  ;;  %vm824_vm7 = vcmask 1046534   ;;  %p1011_p5 = scmp.ne.s32.totalorder %s953_s1, %s1010_s20  ;;  %p1016_p7 = scmp.lt.s32.totalorder %s1010_s20, %s1010_s20 }
  0x17   :  { %vm827_vm8 = vcmask 1047559  }
  0x18   :  { %p1017_p8 = por %p1016_p7, %p1015_p6 }
  0x1a   :  { %113 = vbcast.lane.b32.xlu1 %v111_v9, 256  ;;  %p1018_p9 = pnand %p1017_p8, %p1011_p5 }
  0x1e   :  { %120 = vbcast.lane.b32.xlu1 %v118_v11, 256 }
  0x22   :  { %127 = vbcast.lane.b32.xlu1 %v125_v13, 256 }
  0x26   :  { %134 = vbcast.lane.b32.xlu1 %v132_v15, 256 }
  0x2a   :  { %141 = vbcast.lane.b32.xlu1 %v139_v17, 256  ;;  %99 = vbcast.lane.b32.xlu0 %v97_v21, 256 }
  0x2e   :  { %162 = vbcast.lane.b32.xlu1 %v160_v19, 256  ;;  %169 = vbcast.lane.b32.xlu0 %v167_v23, 256  ;;  %v45_v19 = vld [vmem:[#allocation2 + $0x98] sm:$0xff] }
  0x32   :  { %148 = vbcast.lane.b32.xlu1 %v146_v22, 256 }
  0x36   :  { %155 = vbcast.lane.b32.xlu1 %v153_v24, 256 }
  0x88   :  { %v107_v31 = vpop.permute.xlu1 %106 }
  0x89   :  { %v177_v32 = vmul.f32 %v107_v31, %v32_v25  ;;  %v178_v33 = vmul.f32 %v107_v31, %v33_v26  ;;  %v179_v34 = vmul.f32 %v107_v31, %v34_v27  ;;  %v180_v35 = vmul.f32 %v107_v31, %v35_v28  ;;  %v46_v27 = vld [vmem:[#allocation2 + $0xa0] sm:$0xff]  ;;  %v47_v28 = vld [vmem:[#allocation2 + $0xa8] sm:$0xff] }
  0x8a   :  { %v181_v36 = vmul.f32 %v107_v31, %v36_v29  ;;  %v182_v37 = vmul.f32 %v107_v31, %v37_v30 }
  0x8b   :  { %v273_v38 = vrot.slane %v177_v32, 4  ;;  %v279_v39 = vrot.slane %v178_v33, 4  ;;  %v285_v40 = vrot.slane %v179_v34, 4  ;;  %v291_v41 = vrot.slane %v180_v35, 4 }
  0x8c   :  { %v297_v42 = vrot.slane %v181_v36, 4  ;;  %v303_v43 = vrot.slane %v182_v37, 4  ;;  %v114_v46 = vpop.permute.xlu1 %113 }
  0x8d   :  { %v274_v44 = vadd.f32 %v273_v38, %v177_v32  ;;  %v280_v45 = vadd.f32 %v279_v39, %v178_v33  ;;  %v286_v49 = vadd.f32 %v285_v40, %v179_v34  ;;  %v292_v50 = vadd.f32 %v291_v41, %v180_v35  ;;  %v48_v39 = vld [vmem:[#allocation2 + $0xb0] sm:$0xff]  ;;  %v49_v40 = vld [vmem:[#allocation2 + $0xb8] sm:$0xff] }
  0x8e   :  { %v298_v52 = vadd.f32 %v297_v42, %v181_v36  ;;  %v304_v53 = vadd.f32 %v303_v43, %v182_v37  ;;  %v183_v57 = vmul.f32 %v114_v46, %v38_v47  ;;  %v184_v58 = vmul.f32 %v114_v46, %v39_v48 }
  0x8f   :  { %v275_v59 = vrot.slane %v274_v44, 2  ;;  %v281_v60 = vrot.slane %v280_v45, 2  ;;  %v287_v61 = vrot.slane %v286_v49, 2  ;;  %v293_v62 = vrot.slane %v292_v50, 2 }
  0x90   :  { %v185_v63 = vmul.f32 %v114_v46, %v40_v51  ;;  %v186_v0 = vmul.f32 %v114_v46, %v41_v54  ;;  %v187_v1 = vmul.f32 %v114_v46, %v42_v55  ;;  %v188_v2 = vmul.f32 %v114_v46, %v43_v56  ;;  %v121_v17 = vpop.permute.xlu1 %120 }
  0x91   :  { %v299_v3 = vrot.slane %v298_v52, 2  ;;  %v305_v4 = vrot.slane %v304_v53, 2  ;;  %v309_v5 = vrot.slane %v183_v57, 4  ;;  %v315_v6 = vrot.slane %v184_v58, 4 }
  0x92   :  { %v276_v7 = vadd.f32 %v275_v59, %v274_v44  ;;  %v282_v8 = vadd.f32 %v281_v60, %v280_v45  ;;  %v288_v9 = vadd.f32 %v287_v61, %v286_v49  ;;  %v294_v10 = vadd.f32 %v293_v62, %v292_v50 }
  0x93   :  { %v310_v11 = vadd.f32 %v309_v5, %v183_v57  ;;  %v316_v12 = vadd.f32 %v315_v6, %v184_v58  ;;  %v321_v13 = vrot.slane %v185_v63, 4  ;;  %v327_v14 = vrot.slane %v186_v0, 4  ;;  %v51_v5 = vld [vmem:[#allocation2 + $0xc8] sm:$0xff] }
  0x94   :  { %v333_v15 = vrot.slane %v187_v1, 4  ;;  %v339_v16 = vrot.slane %v188_v2, 4  ;;  %v300_v20 = vadd.f32 %v299_v3, %v298_v52  ;;  %v306_v21 = vadd.f32 %v305_v4, %v304_v53  ;;  %v128_v3 = vpop.permute.xlu1 %127  ;;  %v50_v4 = vld [vmem:[#allocation2 + $0xc0] sm:$0xff] }
  0x95   :  { %v311_v22 = vrot.slane %v310_v11, 2  ;;  %v277_v23 = vrot.slane %v276_v7, 1  ;;  %v283_v24 = vrot.slane %v282_v8, 1  ;;  %v317_v25 = vrot.slane %v316_v12, 2 }
  0x96   :  { %v322_v26 = vadd.f32 %v321_v13, %v185_v63  ;;  %v328_v29 = vadd.f32 %v327_v14, %v186_v0  ;;  %v334_v30 = vadd.f32 %v333_v15, %v187_v1  ;;  %v189_v31 = vmul.f32 %v121_v17, %v44_v18  ;;  %v54_v18 = vld [vmem:[#allocation2 + $0xe0] sm:$0xff] }
  0x97   :  { %v190_v32 = vmul.f32 %v121_v17, %v45_v19  ;;  %v289_v33 = vrot.slane %v288_v9, 1  ;;  %v295_v34 = vrot.slane %v294_v10, 1  ;;  %v312_v35 = vadd.f32 %v311_v22, %v310_v11 }
  0x98   :  { %v340_v36 = vadd.f32 %v339_v16, %v188_v2  ;;  %v301_v37 = vrot.slane %v300_v20, 1  ;;  %v307_v38 = vrot.slane %v306_v21, 1  ;;  %v191_v41 = vmul.f32 %v121_v17, %v46_v27 }
  0x99   :  { %v192_v42 = vmul.f32 %v121_v17, %v47_v28  ;;  %v1065_v43 = vadd.f32 %v277_v23, %v276_v7  ;;  %v1067_v44 = vadd.f32 %v283_v24, %v282_v8  ;;  %v318_v45 = vadd.f32 %v317_v25, %v316_v12  ;;  %v52_v12 = vld [vmem:[#allocation2 + $0xd0] sm:$0xff] }
  0x9a   :  { %v323_v46 = vrot.slane %v322_v26, 2  ;;  %v329_v47 = vrot.slane %v328_v29, 2  ;;  %v335_v48 = vrot.slane %v334_v30, 2  ;;  %v345_v49 = vrot.slane %v189_v31, 4 }
  0x9b   :  { %v351_v50 = vrot.slane %v190_v32, 4  ;;  %v313_v51 = vrot.slane %v312_v35, 1  ;;  %v341_v52 = vrot.slane %v340_v36, 2  ;;  %v193_v53 = vmul.f32 %v121_v17, %v48_v39 }
  0x9c   :  { %v194_v54 = vmul.f32 %v121_v17, %v49_v40  ;;  %v346_v55 = vadd.f32 %v345_v49, %v189_v31  ;;  %v357_v57 = vrot.slane %v191_v41, 4  ;;  %v363_v58 = vrot.slane %v192_v42, 4  ;;  %v55_v31 = vld [vmem:[#allocation2 + $0xe8] sm:$0xff] }
  0x9d   :  { %v352_v56 = vadd.f32 %v351_v50, %v190_v32  ;;  %v1069_v59 = vadd.f32 %v289_v33, %v288_v9  ;;  %v1071_v60 = vadd.f32 %v295_v34, %v294_v10  ;;  %v1073_v61 = vadd.f32 %v301_v37, %v300_v20  ;;  %v53_v9 = vld [vmem:[#allocation2 + $0xd8] sm:$0xff] }
  0x9e   :  { %v1075_v62 = vadd.f32 %v307_v38, %v306_v21  ;;  %v319_v63 = vrot.slane %v318_v45, 1  ;;  %v347_v0 = vrot.slane %v346_v55, 2  ;;  %v358_v1 = vadd.f32 %v357_v57, %v191_v41  ;;  %v57_v57 = vld [vmem:[#allocation2 + $0xf8] sm:$0xff] }
  0x9f   :  { %v364_v2 = vadd.f32 %v363_v58, %v192_v42  ;;  %v324_v6 = vadd.f32 %v323_v46, %v322_v26  ;;  %v353_v7 = vrot.slane %v352_v56, 2  ;;  %v369_v8 = vrot.slane %v193_v53, 4 }
  0xa0   :  { %v375_v11 = vrot.slane %v194_v54, 4  ;;  %v1077_v13 = vadd.f32 %v313_v51, %v312_v35  ;;  %v330_v10 = vadd.f32 %v329_v47, %v328_v29  ;;  %v336_v14 = vadd.f32 %v335_v48, %v334_v30 }
  0xa1   :  { %v342_v15 = vadd.f32 %v341_v52, %v340_v36  ;;  %v348_v16 = vadd.f32 %v347_v0, %v346_v55  ;;  %v359_v17 = vrot.slane %v358_v1, 2  ;;  %v195_v19 = vmul.f32 %v128_v3, %v50_v4  ;;  %v59_v4 = vld [vmem:[#allocation2 + $0x108] sm:$0xff] }
  0xa2   :  { %v196_v20 = vmul.f32 %v128_v3, %v51_v5  ;;  %v1079_v21 = vadd.f32 %v319_v63, %v318_v45  ;;  %v365_v22 = vrot.slane %v364_v2, 2  ;;  %v197_v23 = vmul.f32 %v128_v3, %v52_v12 }
  0xa3   :  { %v198_v24 = vmul.f32 %v128_v3, %v53_v9  ;;  %v325_v25 = vrot.slane %v324_v6, 1  ;;  %v354_v26 = vadd.f32 %v353_v7, %v352_v56  ;;  %v370_v27 = vadd.f32 %v369_v8, %v193_v53  ;;  %v56_v56 = vld [vmem:[#allocation2 + $0xf0] sm:$0xff] }
  0xa4   :  { %v376_v28 = vadd.f32 %v375_v11, %v194_v54  ;;  %v331_v32 = vrot.slane %v330_v10, 1  ;;  %v337_v33 = vrot.slane %v336_v14, 1  ;;  %v343_v29 = vrot.slane %v342_v15, 1 }
  0xa5   :  { %v199_v30 = vmul.f32 %v128_v3, %v54_v18  ;;  %v349_v34 = vrot.slane %v348_v16, 1  ;;  %v360_v35 = vadd.f32 %v359_v17, %v358_v1  ;;  %v381_v36 = vrot.slane %v195_v19, 4 }
  0xa6   :  { %v387_v37 = vrot.slane %v196_v20, 4  ;;  %v366_v38 = vadd.f32 %v365_v22, %v364_v2  ;;  %v200_v39 = vmul.f32 %v128_v3, %v55_v31  ;;  %v393_v40 = vrot.slane %v197_v23, 4  ;;  %v135_v2 = vpop.permute.xlu1 %134  ;;  %v58_v3 = vld [vmem:[#allocation2 + $0x100] sm:$0xff] }
  0xa7   :  { %v399_v41 = vrot.slane %v198_v24, 4  ;;  %v355_v42 = vrot.slane %v354_v26, 1  ;;  %v371_v45 = vrot.slane %v370_v27, 2  ;;  %v377_v46 = vrot.slane %v376_v28, 2 }
  0xa8   :  { %v382_v47 = vadd.f32 %v381_v36, %v195_v19  ;;  %v388_v48 = vadd.f32 %v387_v37, %v196_v20  ;;  %v394_v49 = vadd.f32 %v393_v40, %v197_v23  ;;  %v405_v51 = vrot.slane %v199_v30, 4 }
  0xa9   :  { %v400_v50 = vadd.f32 %v399_v41, %v198_v24  ;;  %v1081_v52 = vadd.f32 %v325_v25, %v324_v6  ;;  %v1083_v53 = vadd.f32 %v331_v32, %v330_v10  ;;  %v1085_v54 = vadd.f32 %v337_v33, %v336_v14  ;;  %v60_v14 = vld [vmem:[#allocation2 + $0x110] sm:$0xff] }
  0xaa   :  { %v1087_v55 = vadd.f32 %v343_v29, %v342_v15  ;;  %v361_v58 = vrot.slane %v360_v35, 1  ;;  %v367_v63 = vrot.slane %v366_v38, 1  ;;  %v383_v0 = vrot.slane %v382_v47, 2  ;;  %v61_v15 = vld [vmem:[#allocation2 + $0x118] sm:$0xff] }
  0xab   :  { %v411_v1 = vrot.slane %v200_v39, 4  ;;  %v1089_v5 = vadd.f32 %v349_v34, %v348_v16  ;;  %v1091_v7 = vadd.f32 %v355_v42, %v354_v26  ;;  %v372_v6 = vadd.f32 %v371_v45, %v370_v27 }
  0xac   :  { %v378_v8 = vadd.f32 %v377_v46, %v376_v28  ;;  %v389_v11 = vrot.slane %v388_v48, 2  ;;  %v395_v12 = vrot.slane %v394_v49, 2  ;;  %v401_v9 = vrot.slane %v400_v50, 2 }
  0xad   :  { %v406_v10 = vadd.f32 %v405_v51, %v199_v30  ;;  %v201_v17 = vmul.f32 %v135_v2, %v56_v56  ;;  %v202_v18 = vmul.f32 %v135_v2, %v57_v57  ;;  %v203_v19 = vmul.f32 %v135_v2, %v58_v3  ;;  %v62_v51 = vld [vmem:[#allocation2 + $0x120] sm:$0xff]  ;;  %v63_v56 = vld [vmem:[#allocation2 + $0x128] sm:$0xff] }
  0xae   :  { %v204_v20 = vmul.f32 %v135_v2, %v59_v4  ;;  %v1093_v22 = vadd.f32 %v361_v58, %v360_v35  ;;  %v1095_v23 = vadd.f32 %v367_v63, %v366_v38  ;;  %v384_v16 = vadd.f32 %v383_v0, %v382_v47  ;;  %v142_v47 = vpop.permute.xlu1 %141 }
  0xaf   :  { %v412_v24 = vadd.f32 %v411_v1, %v200_v39  ;;  %v373_v25 = vrot.slane %v372_v6, 1  ;;  %v379_v26 = vrot.slane %v378_v8, 1  ;;  %v205_v27 = vmul.f32 %v135_v2, %v60_v14 }
  0xb0   :  { %v206_v28 = vmul.f32 %v135_v2, %v61_v15  ;;  %v390_v31 = vadd.f32 %v389_v11, %v388_v48  ;;  %v396_v32 = vadd.f32 %v395_v12, %v394_v49  ;;  %v1097_v33 = vadd.f32 %v401_v9, %v400_v50  ;;  %v64_v2 = vld [vmem:[#allocation2 + $0x130] sm:$0xff]  ;;  %v65_v11 = vld [vmem:[#allocation2 + $0x138] sm:$0xff]  ;;  %v66_v12 = vld [vmem:[#allocation2 + $0x140] sm:$0xff] }
  0xb1   :  { %v407_v29 = vrot.slane %v406_v10, 2  ;;  %v417_v30 = vrot.slane %v201_v17, 4  ;;  %v423_v34 = vrot.slane %v202_v18, 4  ;;  %v429_v36 = vrot.slane %v203_v19, 4  ;;  %v67_v9 = vld [vmem:[#allocation2 + $0x148] sm:$0xff] }
  0xb2   :  { %v435_v37 = vrot.slane %v204_v20, 4  ;;  %v385_v40 = vrot.slane %v384_v16, 1  ;;  %v413_v35 = vrot.slane %v412_v24, 2  ;;  %v441_v41 = vrot.slane %v205_v27, 4 }
  0xb3   :  { %v447_v38 = vrot.slane %v206_v28, 4  ;;  %v418_v42 = vadd.f32 %v417_v30, %v201_v17  ;;  %v424_v45 = vadd.f32 %v423_v34, %v202_v18  ;;  %v430_v39 = vadd.f32 %v429_v36, %v203_v19 }
  0xb4   :  { %v436_v46 = vadd.f32 %v435_v37, %v204_v20  ;;  %v391_v48 = vrot.slane %v390_v31, 1  ;;  %v397_v49 = vrot.slane %v396_v32, 1  ;;  %v442_v50 = vadd.f32 %v441_v41, %v205_v27 }
  0xb5   :  { %v448_v57 = vadd.f32 %v447_v38, %v206_v28  ;;  %v1099_v58 = vadd.f32 %v373_v25, %v372_v6  ;;  %v1101_v63 = vadd.f32 %v379_v26, %v378_v8  ;;  %v403_v0 = vrot.slane %v1097_v33, 1 }
  0xb6   :  { %v408_v1 = vadd.f32 %v407_v29, %v406_v10  ;;  %v419_v3 = vrot.slane %v418_v42, 2  ;;  %v425_v4 = vrot.slane %v424_v45, 2  ;;  %v207_v14 = vmul.f32 %v142_v47, %v62_v51 }
  0xb7   :  { %v208_v15 = vmul.f32 %v142_v47, %v63_v56  ;;  %v1104_v17 = vadd.f32 %v385_v40, %v384_v16  ;;  %v414_v18 = vadd.f32 %v413_v35, %v412_v24  ;;  %v431_v19 = vrot.slane %v430_v39, 2 }
  0xb8   :  { %v437_v20 = vrot.slane %v436_v46, 2  ;;  %v1106_v6 = vadd.f32 %v391_v48, %v390_v31  ;;  %v1108_v8 = vadd.f32 %v397_v49, %v396_v32  ;;  %v443_v25 = vrot.slane %v442_v50, 2 }
  0xb9   :  { %v449_v26 = vrot.slane %v448_v57, 2  ;;  %v209_v10 = vmul.f32 %v142_v47, %v64_v2  ;;  %v210_v27 = vmul.f32 %v142_v47, %v65_v11  ;;  %v211_v28 = vmul.f32 %v142_v47, %v66_v12 }
  0xba   :  { %1506 = vst [vmem:[#allocation8_spill] sm:$0xff] %v1108_v8  ;;  %v212_v29 = vmul.f32 %v142_v47, %v67_v9  ;;  %v420_v30 = vadd.f32 %v419_v3, %v418_v42  ;;  %v426_v34 = vadd.f32 %v425_v4, %v424_v45  ;;  %v453_v36 = vrot.slane %v207_v14, 4  ;;  %v636_v42 = vpop.xlane.xlu0 %635 }
  0xbb   :  { %v459_v37 = vrot.slane %v208_v15, 4  ;;  %v409_v41 = vrot.slane %v408_v1, 1  ;;  %v415_v16 = vrot.slane %v414_v18, 1  ;;  %v432_v40 = vadd.f32 %v431_v19, %v430_v39 }
  0xbc   :  { %v438_v24 = vadd.f32 %v437_v20, %v436_v46  ;;  %v444_v35 = vadd.f32 %v443_v25, %v442_v50  ;;  %v450_v38 = vadd.f32 %v449_v26, %v448_v57  ;;  %v454_v31 = vadd.f32 %v453_v36, %v207_v14 }
  0xbd   :  { %v460_v51 = vadd.f32 %v459_v37, %v208_v15  ;;  %v465_v32 = vrot.slane %v209_v10, 4  ;;  %v471_v56 = vrot.slane %v210_v27, 4  ;;  %v477_v48 = vrot.slane %v211_v28, 4  ;;  %v82_v37 = vld [vmem:[#allocation2 + $0x1c0] sm:$0xff] }
  0xbe   :  { %v483_v49 = vrot.slane %v212_v29, 4  ;;  %v421_v2 = vrot.slane %v420_v30, 1  ;;  %v427_v11 = vrot.slane %v426_v34, 1  ;;  %v455_v12 = vrot.slane %v454_v31, 2 }
  0xbf   :  { %v461_v47 = vrot.slane %v460_v51, 2  ;;  %v433_v45 = vrot.slane %v432_v40, 1  ;;  %v466_v3 = vadd.f32 %v465_v32, %v209_v10  ;;  %v472_v4 = vadd.f32 %v471_v56, %v210_v27  ;;  %v163_v27 = vpop.permute.xlu1 %162  ;;  %v83_v32 = vld [vmem:[#allocation2 + $0x1c8] sm:$0xff]  ;;  %v85_v56 = vld [vmem:[#allocation2 + $0x1d8] sm:$0xff] }
  0xc0   :  { %v478_v9 = vadd.f32 %v477_v48, %v211_v28  ;;  %v439_v8 = vrot.slane %v438_v24, 1  ;;  %v445_v39 = vrot.slane %v444_v35, 1  ;;  %v451_v46 = vrot.slane %v450_v38, 1  ;;  %v80_v28 = vld [vmem:[#allocation2 + $0x1b0] sm:$0xff] }
  0xc1   :  { %v484_v50 = vadd.f32 %v483_v49, %v212_v29  ;;  %v1111_v57 = vadd.f32 %v403_v0, %v1097_v33  ;;  %v1113_v14 = vadd.f32 %v409_v41, %v408_v1  ;;  %v456_v15 = vadd.f32 %v455_v12, %v454_v31  ;;  %v81_v1 = vld [vmem:[#allocation2 + $0x1b8] sm:$0xff] }
  0xc2   :  { %v1115_v19 = vmax.f32 %v636_v42, 1.0  ;;  %v1117_v20 = vadd.f32 %v415_v16, %v414_v18  ;;  %v1119_v25 = vadd.f32 %v421_v2, %v420_v30  ;;  %v1121_v26 = vadd.f32 %v427_v11, %v426_v34 }
  0xc3   :  { %v1123_v10 = vadd.f32 %v461_v47, %v460_v51  ;;  %v1125_v36 = vadd.f32 %v433_v45, %v432_v40  ;;  %v467_v29 = vrot.slane %v466_v3, 2  ;;  %v473_v33 = vrot.slane %v472_v4, 2  ;;  %v84_v40 = vld [vmem:[#allocation2 + $0x1d0] sm:$0xff] }
  0xc4   :  { %1507 = vst [vmem:[#allocation9_spill] sm:$0xff] %v1119_v25  ;;  %1508 = vst [vmem:[#allocation10_spill] sm:$0xff] %v1121_v26  ;;  %v479_v0 = vrot.slane %v478_v9, 2  ;;  %v1127_v41 = vadd.f32 %v439_v8, %v438_v24  ;;  %v1129_v31 = vadd.f32 %v445_v39, %v444_v35  ;;  %v1131_v18 = vadd.f32 %v451_v46, %v450_v38 }
  0xc5   :  { %1509 = vst [vmem:[#allocation11_spill] sm:$0xff] %v1125_v36  ;;  %v485_v30 = vrot.slane %v484_v50, 2  ;;  %v457_v34 = vrot.slane %v456_v15, 1  ;;  %v645_v16 = vrot.slane %v1115_v19, 1  ;;  %v646_v51 = vrot.slane %v1115_v19, 2 }
  0xc6   :  { %1510 = vst [vmem:[#allocation12_spill] sm:$0xff] %v1127_v41  ;;  %1511 = vst [vmem:[#allocation13_spill] sm:$0xff] %v1129_v31  ;;  %v225_v48 = vmul.f32 %v163_v27, %v80_v28  ;;  %v463_v49 = vrot.slane %v1123_v10, 1  ;;  %v647_v2 = vrot.slane %v1115_v19, 3  ;;  %v226_v8 = vmul.f32 %v163_v27, %v81_v1 }
  0xc7   :  { %1512 = vst [vmem:[#allocation14_spill] sm:$0xff] %v1131_v18  ;;  %v227_v24 = vmul.f32 %v163_v27, %v82_v37  ;;  %v468_v35 = vadd.f32 %v467_v29, %v466_v3  ;;  %v474_v11 = vadd.f32 %v473_v33, %v472_v4  ;;  %v480_v38 = vadd.f32 %v479_v0, %v478_v9 }
  0xc8   :  { %v648_v12 = vrot.slane %v1115_v19, 4  ;;  %v486_v47 = vadd.f32 %v485_v30, %v484_v50  ;;  %v228_v42 = vmul.f32 %v163_v27, %v83_v32  ;;  %v229_v45 = vmul.f32 %v163_v27, %v84_v40 }
  0xc9   :  { %v230_v39 = vmul.f32 %v163_v27, %v85_v56  ;;  %v1138_v46 = vadd.f32 %v457_v34, %v456_v15  ;;  %v561_v18 = vrot.slane %v225_v48, 4  ;;  %v567_v31 = vrot.slane %v226_v8, 4  ;;  %v640_v27 = vpop.xlane.xlu0 %639 }
  0xca   :  { %v573_v28 = vrot.slane %v227_v24, 4  ;;  %968 = vrcp.f32 %v1115_v19  ;;  %v579_v41 = vrot.slane %v228_v42, 4  ;;  %v585_v36 = vrot.slane %v229_v45, 4 }
  0xcb   :  { %1513 = vst [vmem:[#allocation15_spill] sm:$0xff] %v1138_v46  ;;  %v591_v1 = vrot.slane %v230_v39, 4  ;;  %v649_v3 = vrot.slane %v1115_v19, 5  ;;  %970 = vrcp.f32 %v645_v16  ;;  %v562_v4 = vadd.f32 %v561_v18, %v225_v48 }
  0xcc   :  { %v568_v9 = vadd.f32 %v567_v31, %v226_v8  ;;  %v574_v29 = vadd.f32 %v573_v28, %v227_v24  ;;  %v580_v50 = vadd.f32 %v579_v41, %v228_v42  ;;  %v586_v33 = vadd.f32 %v585_v36, %v229_v45  ;;  %v149_v31 = vpop.permute.xlu1 %148  ;;  %v68_v41 = vld [vmem:[#allocation2 + $0x150] sm:$0xff]  ;;  %v69_v45 = vld [vmem:[#allocation2 + $0x158] sm:$0xff]  ;;  %v71_v28 = vld [vmem:[#allocation2 + $0x168] sm:$0xff] }
  0xcd   :  { %v592_v0 = vadd.f32 %v591_v1, %v230_v39  ;;  %v469_v15 = vrot.slane %v468_v35, 1  ;;  %v475_v37 = vrot.slane %v474_v11, 1  ;;  %v650_v30 = vrot.slane %v1115_v19, 6  ;;  %v70_v39 = vld [vmem:[#allocation2 + $0x160] sm:$0xff] }
  0xce   :  { %972 = vrcp.f32 %v646_v51  ;;  %v481_v34 = vrot.slane %v480_v38, 1  ;;  %v487_v32 = vrot.slane %v486_v47, 1  ;;  %v651_v40 = vrot.slane %v1115_v19, 7 }
  0xcf   :  { %974 = vrcp.f32 %v647_v2  ;;  %v563_v56 = vrot.slane %v562_v4, 2  ;;  %v569_v16 = vrot.slane %v568_v9, 2  ;;  %v1144_v18 = vmax.f32 %v640_v27, 1.0 }
  0xd0   :  { %976 = vrcp.f32 %v648_v12  ;;  %v575_v36 = vrot.slane %v574_v29, 2  ;;  %v581_v48 = vrot.slane %v580_v50, 2  ;;  %v587_v8 = vrot.slane %v586_v33, 2 }
  0xd1   :  { %1514 = vst [vmem:[#allocation16_spill] sm:$0xff] %v1144_v18  ;;  %v593_v24 = vrot.slane %v592_v0, 2  ;;  %v1147_v42 = vadd.f32 %v463_v49, %v1123_v10  ;;  %v1149_v51 = vadd.f32 %v469_v15, %v468_v35  ;;  %978 = vrcp.f32 %v649_v3  ;;  %v72_v49 = vld [vmem:[#allocation2 + $0x170] sm:$0xff]  ;;  %v73_v35 = vld [vmem:[#allocation2 + $0x178] sm:$0xff]  ;;  %v100_v3 = vpop.permute.xlu0 %99  ;;  %v26_v15 = vld [vmem:[#allocation2] sm:$0xff] }
  0xd2   :  { %v652_v19 = vrot.slane %v1144_v18, 1  ;;  %v1152_v2 = vadd.f32 %v475_v37, %v474_v11  ;;  %v1154_v12 = vadd.f32 %v481_v34, %v480_v38  ;;  %980 = vrcp.f32 %v650_v30  ;;  %v27_v34 = vld [vmem:[#allocation2 + $0x8] sm:$0xff] }
  0xd3   :  { %1515 = vst [vmem:[#allocation17_spill] sm:$0xff] %v1147_v42  ;;  %1516 = vst [vmem:[#allocation18_spill] sm:$0xff] %v1149_v51  ;;  %v213_v1 = vmul.f32 %v149_v31, %v68_v41  ;;  %v1156_v27 = vadd.f32 %v487_v32, %v486_v47  ;;  %982 = vrcp.f32 %v651_v40  ;;  %v1158_v46 = vadd.f32 %v563_v56, %v562_v4  ;;  %v28_v40 = vld [vmem:[#allocation2 + $0x10] sm:$0xff]  ;;  %v29_v41 = vld [vmem:[#allocation2 + $0x18] sm:$0xff] }
  0xd4   :  { %1517 = vst [vmem:[#allocation19_spill] sm:$0xff] %v1152_v2  ;;  %1518 = vst [vmem:[#allocation20_spill] sm:$0xff] %v1154_v12  ;;  %v1160_v10 = vadd.f32 %v569_v16, %v568_v9  ;;  %v1162_v11 = vadd.f32 %v575_v36, %v574_v29  ;;  %v1164_v38 = vadd.f32 %v581_v48, %v580_v50  ;;  %984 = vrcp.f32 %v652_v19 }
  0xd5   :  { %1519 = vst [vmem:[#allocation21_spill] sm:$0xff] %v1156_v27  ;;  %1520 = vst [vmem:[#allocation22_spill] sm:$0xff] %v1158_v46  ;;  %v1166_v37 = vadd.f32 %v587_v8, %v586_v33  ;;  %v1168_v30 = vadd.f32 %v593_v24, %v592_v0  ;;  %v214_v47 = vmul.f32 %v149_v31, %v69_v45  ;;  %v489_v16 = vrot.slane %v213_v1, 4  ;;  %v30_v33 = vld [vmem:[#allocation2 + $0x20] sm:$0xff]  ;;  %v31_v45 = vld [vmem:[#allocation2 + $0x28] sm:$0xff] }
  0xd6   :  { %1521 = vst [vmem:[#allocation23_spill] sm:$0xff] %v1160_v10  ;;  %1522 = vst [vmem:[#allocation24_spill] sm:$0xff] %v1162_v11  ;;  %v215_v32 = vmul.f32 %v149_v31, %v70_v39  ;;  %v216_v4 = vmul.f32 %v149_v31, %v71_v28  ;;  %v217_v9 = vmul.f32 %v149_v31, %v72_v49 }
  0xd7   :  { %1523 = vst [vmem:[#allocation25_spill] sm:$0xff] %v1164_v38  ;;  %1524 = vst [vmem:[#allocation26_spill] sm:$0xff] %v1166_v37  ;;  %v218_v56 = vmul.f32 %v149_v31, %v73_v35  ;;  %v171_v18 = vmul.f32 %v100_v3, %v26_v15  ;;  %v1170_v10 = vpop.eup %968  ;;  %v495_v29 = vrot.slane %v214_v47, 4  ;;  %v172_v48 = vmul.f32 %v100_v3, %v27_v34 }
  0xd8   :  { %1525 = vst [vmem:[#allocation27_spill] sm:$0xff] %v1168_v30  ;;  %v501_v50 = vrot.slane %v215_v32, 4  ;;  %v507_v36 = vrot.slane %v216_v4, 4  ;;  %v1172_v0 = vpop.eup %970  ;;  %v490_v8 = vadd.f32 %v489_v16, %v213_v1  ;;  %v513_v24 = vrot.slane %v217_v9, 4 }
  0xd9   :  { %v519_v19 = vrot.slane %v218_v56, 4  ;;  %v1174_v39 = vmul.f32 %v100_v3, %v28_v40  ;;  %v496_v28 = vadd.f32 %v495_v29, %v214_v47  ;;  %v1176_v35 = vmul.f32 %v100_v3, %v29_v41 }
  0xda   :  { %v502_v31 = vadd.f32 %v501_v50, %v215_v32  ;;  %v508_v49 = vadd.f32 %v507_v36, %v216_v4  ;;  %v491_v30 = vrot.slane %v490_v8, 2  ;;  %v514_v37 = vadd.f32 %v513_v24, %v217_v9 }
  0xdb   :  { %v1178_v15 = vpop.eup %972  ;;  %v520_v38 = vadd.f32 %v519_v19, %v218_v56  ;;  %v1180_v11 = vmul.f32 %v100_v3, %v30_v33  ;;  %v497_v1 = vrot.slane %v496_v28, 2  ;;  %v176_v27 = vmul.f32 %v100_v3, %v31_v45 }
  0xdc   :  { %v1182_v34 = vpop.eup %974  ;;  %v503_v16 = vrot.slane %v502_v31, 2  ;;  %v509_v46 = vrot.slane %v508_v49, 2  ;;  %v492_v47 = vadd.f32 %v491_v30, %v490_v8  ;;  %v515_v32 = vrot.slane %v514_v37, 2 }
  0xdd   :  { %v1184_v40 = vpop.eup %976  ;;  %v521_v4 = vrot.slane %v520_v38, 2  ;;  %v237_v41 = vrot.slane %v171_v18, 4  ;;  %v498_v29 = vadd.f32 %v497_v1, %v496_v28  ;;  %v243_v12 = vrot.slane %v172_v48, 4 }
  0xde   :  { %v504_v50 = vadd.f32 %v503_v16, %v502_v31  ;;  %v510_v36 = vadd.f32 %v509_v46, %v508_v49  ;;  %v1186_v9 = vpop.eup %978  ;;  %v493_v56 = vrot.slane %v492_v47, 1  ;;  %v516_v33 = vadd.f32 %v515_v32, %v514_v37 }
  0xdf   :  { %v522_v24 = vadd.f32 %v521_v4, %v520_v38  ;;  %v238_v19 = vadd.f32 %v237_v41, %v171_v18  ;;  %v1188_v2 = vpop.eup %980  ;;  %v499_v51 = vrot.slane %v498_v29, 1  ;;  %v244_v42 = vadd.f32 %v243_v12, %v172_v48 }
  0xe0   :  { %v505_v3 = vrot.slane %v504_v50, 1  ;;  %v511_v45 = vrot.slane %v510_v36, 1  ;;  %v983_v30 = vpop.eup %982  ;;  %v494_v8 = vadd.f32 %v493_v56, %v492_v47  ;;  %v517_v26 = vrot.slane %v516_v33, 1 }
  0xe1   :  { %v523_v25 = vrot.slane %v522_v24, 1  ;;  %v239_v28 = vrot.slane %v238_v19, 2  ;;  %v500_v31 = vadd.f32 %v499_v51, %v498_v29  ;;  %v245_v1 = vrot.slane %v244_v42, 2  ;;  %v1190_v16 = vpop.eup %984 }
  0xe2   :  { %v506_v46 = vadd.f32 %v505_v3, %v504_v50  ;;  %v512_v49 = vadd.f32 %v511_v45, %v510_v36  ;;  %v518_v37 = vadd.f32 %v517_v26, %v516_v33  ;;  %v1192_v18 = vmul.f32 %v983_v30, %v494_v8 }
  0xe3   :  { %v524_v38 = vadd.f32 %v523_v25, %v522_v24  ;;  %v240_v32 = vadd.f32 %v239_v28, %v238_v19  ;;  %v1194_v4 = vmul.f32 %v983_v30, %v500_v31  ;;  %v246_v48 = vadd.f32 %v245_v1, %v244_v42 }
  0xe4   :  { %v1196_v41 = vmul.f32 %v983_v30, %v506_v46  ;;  %v1198_v12 = vmul.f32 %v983_v30, %v512_v49  ;;  %v1200_v47 = vmul.f32 %v983_v30, %v518_v37  ;;  %v826_v29 = vrot.slane %v1192_v18, 1 }
  0xe5   :  { %v1202_v51 = vmul.f32 %v983_v30, %v524_v38  ;;  %v241_v50 = vrot.slane %v240_v32, 1  ;;  %v247_v56 = vrot.slane %v246_v48, 1  ;;  %v249_v42 = vrot.slane %v1174_v39, 4 }
  0xe6   :  { %v255_v45 = vrot.slane %v1176_v35, 4  ;;  %v261_v30 = vrot.slane %v1180_v11, 4  ;;  %v267_v8 = vrot.slane %v176_v27, 4  ;;  %v1219_v46 = vmul.f32 %v1172_v0, %v1065_v43 }
  0xe7   :  { %v242_v19 = vadd.f32 %v241_v50, %v240_v32  ;;  %v248_v3 = vadd.f32 %v247_v56, %v246_v48  ;;  %v250_v28 = vadd.f32 %v249_v42, %v1174_v39  ;;  %v1223_v49 = vmul.f32 %v1172_v0, %v1067_v44 }
  0xe8   :  { %v256_v1 = vadd.f32 %v255_v45, %v1176_v35  ;;  %v262_v37 = vadd.f32 %v261_v30, %v1180_v11  ;;  %v268_v38 = vadd.f32 %v267_v8, %v176_v27  ;;  %v1232_v48 = vmul.f32 %v1172_v0, %v1069_v59 }
  0xe9   :  { %v1215_v31 = vmul.f32 %v1170_v10, %v242_v19  ;;  %v1228_v32 = vmul.f32 %v1170_v10, %v248_v3  ;;  %v251_v39 = vrot.slane %v250_v28, 2  ;;  %v1236_v43 = vmul.f32 %v1172_v0, %v1071_v60 }
  0xea   :  { %v1240_v44 = vmul.f32 %v1172_v0, %v1073_v61  ;;  %v257_v35 = vrot.slane %v256_v1, 2  ;;  %v263_v50 = vrot.slane %v262_v37, 2  ;;  %v269_v11 = vrot.slane %v268_v38, 2 }
  0xeb   :  { %v1244_v27 = vmul.f32 %v1172_v0, %v1075_v62  ;;  %v252_v56 = vadd.f32 %v251_v39, %v250_v28  ;;  %v1248_v59 = vmul.f32 %v1178_v15, %v1077_v13  ;;  %v1252_v60 = vmul.f32 %v1178_v15, %v1079_v21  ;;  %v1526_v39 = vld [vmem:[#allocation8_spill] sm:$0xff] }
  0xec   :  { %v1256_v61 = vmul.f32 %v1178_v15, %v1081_v52  ;;  %v258_v19 = vadd.f32 %v257_v35, %v256_v1  ;;  %v264_v42 = vadd.f32 %v263_v50, %v262_v37  ;;  %v270_v3 = vadd.f32 %v269_v11, %v268_v38  ;;  %v1527_v11 = vld [vmem:[#allocation9_spill] sm:$0xff] }
  0xed   :  { %v1260_v62 = vmul.f32 %v1178_v15, %v1083_v53  ;;  %v253_v0 = vrot.slane %v252_v56, 1  ;;  %v1264_v13 = vmul.f32 %v1178_v15, %v1085_v54  ;;  %v1268_v21 = vmul.f32 %v1178_v15, %v1087_v55 }
  0xee   :  { %v687_v52 = vmul.f32 %v1182_v34, %v1089_v5  ;;  %v259_v45 = vrot.slane %v258_v19, 1  ;;  %v265_v30 = vrot.slane %v264_v42, 1  ;;  %v271_v8 = vrot.slane %v270_v3, 1 }
  0xef   :  { %v688_v53 = vmul.f32 %v1182_v34, %v1091_v7  ;;  %v254_v28 = vadd.f32 %v253_v0, %v252_v56  ;;  %v1276_v54 = vmul.f32 %v1182_v34, %v1093_v22  ;;  %v1280_v55 = vmul.f32 %v1182_v34, %v1095_v23 }
  0xf0   :  { %v1284_v5 = vmul.f32 %v1182_v34, %v1099_v58  ;;  %v260_v15 = vadd.f32 %v259_v45, %v258_v19  ;;  %v266_v1 = vadd.f32 %v265_v30, %v264_v42  ;;  %v272_v37 = vadd.f32 %v271_v8, %v270_v3  ;;  %v1528_v19 = vld [vmem:[#allocation10_spill] sm:$0xff]  ;;  %v1529_v42 = vld [vmem:[#allocation11_spill] sm:$0xff]  ;;  %v1531_v45 = vld [vmem:[#allocation13_spill] sm:$0xff] }
  0xf1   :  { %v1288_v7 = vmul.f32 %v1182_v34, %v1101_v63  ;;  %v668_v22 = vmul.f32 %v1170_v10, %v254_v28  ;;  %v694_v38 = vmul.f32 %v1184_v40, %v1104_v17  ;;  %v695_v23 = vmul.f32 %v1184_v40, %v1106_v6  ;;  %v1532_v30 = vld [vmem:[#allocation14_spill] sm:$0xff]  ;;  %v1534_v28 = vld [vmem:[#allocation17_spill] sm:$0xff] }
  0xf2   :  { %v696_v58 = vmul.f32 %v1184_v40, %v1526_v39  ;;  %v669_v35 = vmul.f32 %v1170_v10, %v260_v15  ;;  %v1299_v50 = vmul.f32 %v1170_v10, %v266_v1  ;;  %v1302_v63 = vmul.f32 %v1170_v10, %v272_v37  ;;  %v1535_v1 = vld [vmem:[#allocation18_spill] sm:$0xff]  ;;  %v1536_v39 = vld [vmem:[#allocation19_spill] sm:$0xff] }
  0xf3   :  { %v1306_v34 = vmul.f32 %v1184_v40, %v1111_v57  ;;  %v1310_v17 = vmul.f32 %v1184_v40, %v1113_v14  ;;  %v1314_v6 = vmul.f32 %v1184_v40, %v1117_v20  ;;  %v701_v56 = vmul.f32 %v1186_v9, %v1527_v11  ;;  %v1530_v57 = vld [vmem:[#allocation12_spill] sm:$0xff]  ;;  %v1533_v40 = vld [vmem:[#allocation15_spill] sm:$0xff] }
  0xf4   :  { %v702_v10 = vmul.f32 %v1186_v9, %v1528_v19  ;;  %v703_v3 = vmul.f32 %v1186_v9, %v1529_v42  ;;  %v1324_v0 = vmul.f32 %v1186_v9, %v1530_v57  ;;  %v1328_v14 = vmul.f32 %v1186_v9, %v1531_v45  ;;  %v1537_v19 = vld [vmem:[#allocation20_spill] sm:$0xff]  ;;  %v1538_v57 = vld [vmem:[#allocation21_spill] sm:$0xff] }
  0xf5   :  { %v1332_v20 = vmul.f32 %v1186_v9, %v1532_v30  ;;  %v708_v8 = vmul.f32 %v1188_v2, %v1533_v40  ;;  %v709_v15 = vmul.f32 %v1188_v2, %v1534_v28  ;;  %v710_v37 = vmul.f32 %v1188_v2, %v1535_v1 }
  0xf6   :  { %v1342_v11 = vmul.f32 %v1188_v2, %v1536_v39  ;;  %v1346_v42 = vmul.f32 %v1188_v2, %v1537_v19  ;;  %v1350_v9 = vmul.f32 %v1188_v2, %v1538_v57  ;;  %v808_v45 = vrot.slane %v1219_v46, 7 }
  0xf7   :  { %v811_v30 = vrot.slane %v1248_v59, 6  ;;  %v814_v40 = vrot.slane %v687_v52, 5  ;;  %v817_v28 = vrot.slane %v694_v38, 4  ;;  %v820_v24 = vrot.slane %v701_v56, 3 }
  0xf8   :  { %v823_v1 = vrot.slane %v708_v8, 2  ;;  %v810_v39 = vsel %vm809_vm2, %v808_v45, %v1215_v31  ;;  %v829_v33 = vrot.slane %v1223_v49, 7  ;;  %v831_v19 = vrot.slane %v1252_v60, 6 }
  0xf9   :  { %v833_v36 = vrot.slane %v688_v53, 5  ;;  %v813_v25 = vsel %vm812_vm3, %v811_v30, %v810_v39  ;;  %v835_v2 = vrot.slane %v695_v23, 4  ;;  %v837_v57 = vrot.slane %v702_v10, 3 }
  0xfa   :  { %v839_v26 = vrot.slane %v709_v15, 2  ;;  %v816_v46 = vsel %vm815_vm4, %v814_v40, %v813_v25  ;;  %v830_v59 = vsel %vm809_vm2, %v829_v33, %v1228_v32  ;;  %v843_v52 = vrot.slane %v1232_v48, 7 }
  0xfb   :  { %v845_v38 = vrot.slane %v1256_v61, 6  ;;  %v819_v31 = vsel %vm818_vm5, %v817_v28, %v816_v46  ;;  %v832_v49 = vsel %vm812_vm3, %v831_v19, %v830_v59  ;;  %v847_v60 = vrot.slane %v1276_v54, 5  ;;  %v156_v46 = vpop.permute.xlu1 %155  ;;  %v75_v59 = vld [vmem:[#allocation2 + $0x188] sm:$0xff] }
  0xfc   :  { %v849_v53 = vrot.slane %v696_v58, 4  ;;  %v822_v23 = vsel %vm821_vm6, %v820_v24, %v819_v31  ;;  %v834_v56 = vsel %vm815_vm4, %v833_v36, %v832_v49  ;;  %v844_v25 = vsel %vm809_vm2, %v843_v52, %v668_v22  ;;  %v76_v31 = vld [vmem:[#allocation2 + $0x190] sm:$0xff]  ;;  %v77_v49 = vld [vmem:[#allocation2 + $0x198] sm:$0xff] }
  0xfd   :  { %v851_v10 = vrot.slane %v703_v3, 3  ;;  %v825_v33 = vsel %vm824_vm7, %v823_v1, %v822_v23  ;;  %v836_v32 = vsel %vm818_vm5, %v835_v2, %v834_v56  ;;  %v846_v48 = vsel %vm812_vm3, %v845_v38, %v844_v25  ;;  %v79_v23 = vld [vmem:[#allocation2 + $0x1a8] sm:$0xff] }
  0xfe   :  { %v853_v61 = vrot.slane %v710_v37, 2  ;;  %v828_v8 = vsel %vm827_vm8, %v826_v29, %v825_v33  ;;  %v838_v54 = vsel %vm821_vm6, %v837_v57, %v836_v32  ;;  %v848_v24 = vsel %vm815_vm4, %v847_v60, %v846_v48 }
  0xff   :  { %v857_v36 = vrot.slane %v1236_v43, 7  ;;  %v840_v22 = vsel %vm824_vm7, %v839_v26, %v838_v54  ;;  %v850_v58 = vsel %vm818_vm5, %v849_v53, %v848_v24  ;;  %v859_v3 = vrot.slane %v1260_v62, 6  ;;  %935 = vst [vmem:[#allocation5] sm:$0xff] %v828_v8 }
 0x100   :  { %v861_v15 = vrot.slane %v1280_v55, 5  ;;  %v1539_v37 = vrot.slane %v1194_v4, 1  ;;  %v852_v29 = vsel %vm821_vm6, %v851_v10, %v850_v58  ;;  %v863_v30 = vrot.slane %v1306_v34, 4 }
 0x101   :  { %v858_v45 = vsel %vm809_vm2, %v857_v36, %v669_v35  ;;  %v854_v43 = vsel %vm824_vm7, %v853_v61, %v852_v29  ;;  %v865_v40 = vrot.slane %v1324_v0, 3  ;;  %v867_v62 = vrot.slane %v1342_v11, 2 }
 0x102   :  { %v842_v18 = vsel %vm827_vm8, %v1539_v37, %v840_v22  ;;  %v860_v26 = vsel %vm812_vm3, %v859_v3, %v858_v45  ;;  %v1540_v55 = vrot.slane %v1196_v41, 1  ;;  %v871_v1 = vrot.slane %v1240_v44, 7 }
 0x103   :  { %936 = vst [vmem:[#allocation5 + $0x8] sm:$0xff] %v842_v18  ;;  %v862_v28 = vsel %vm815_vm4, %v861_v15, %v860_v26  ;;  %v873_v35 = vrot.slane %v1264_v13, 6  ;;  %v875_v39 = vrot.slane %v1284_v5, 5  ;;  %v877_v19 = vrot.slane %v1310_v17, 4 }
 0x104   :  { %v856_v4 = vsel %vm827_vm8, %v1540_v55, %v854_v43  ;;  %v864_v34 = vsel %vm818_vm5, %v863_v30, %v862_v28  ;;  %v879_v0 = vrot.slane %v1328_v14, 3  ;;  %v872_v41 = vsel %vm809_vm2, %v871_v1, %v1299_v50  ;;  %v74_v14 = vld [vmem:[#allocation2 + $0x180] sm:$0xff]  ;;  %v1546_v1 = vld [vmem:[#allocation24_spill] sm:$0xff] }
 0x105   :  { %937 = vst [vmem:[#allocation5 + $0x10] sm:$0xff] %v856_v4  ;;  %v866_v11 = vsel %vm821_vm6, %v865_v40, %v864_v34  ;;  %v881_v2 = vrot.slane %v1346_v42, 2  ;;  %v885_v44 = vrot.slane %v1244_v27, 7  ;;  %v874_v57 = vsel %vm812_vm3, %v873_v35, %v872_v41  ;;  %v1545_v40 = vld [vmem:[#allocation23_spill] sm:$0xff] }
 0x106   :  { %v868_v13 = vsel %vm824_vm7, %v867_v62, %v866_v11  ;;  %v887_v5 = vrot.slane %v1268_v21, 6  ;;  %v889_v17 = vrot.slane %v1288_v7, 5  ;;  %v1541_v52 = vrot.slane %v1198_v12, 1  ;;  %v78_v12 = vld [vmem:[#allocation2 + $0x1a0] sm:$0xff] }
 0x107   :  { %v876_v50 = vsel %vm815_vm4, %v875_v39, %v874_v57  ;;  %v886_v27 = vsel %vm809_vm2, %v885_v44, %v1302_v63  ;;  %v891_v42 = vrot.slane %v1314_v6, 4  ;;  %v893_v60 = vrot.slane %v1332_v20, 3 }
 0x108   :  { %v870_v38 = vsel %vm827_vm8, %v1541_v52, %v868_v13  ;;  %v878_v21 = vsel %vm818_vm5, %v877_v19, %v876_v50  ;;  %v888_v7 = vsel %vm812_vm3, %v887_v5, %v886_v27  ;;  %v895_v53 = vrot.slane %v1350_v9, 2  ;;  %v1547_v19 = vld [vmem:[#allocation25_spill] sm:$0xff]  ;;  %v1549_v13 = vld [vmem:[#allocation27_spill] sm:$0xff] }
 0x109   :  { %938 = vst [vmem:[#allocation5 + $0x18] sm:$0xff] %v870_v38  ;;  %v880_v56 = vsel %vm821_vm6, %v879_v0, %v878_v21  ;;  %v890_v25 = vsel %vm815_vm4, %v889_v17, %v888_v7  ;;  %v219_v63 = vmul.f32 %v156_v46, %v74_v14  ;;  %v220_v10 = vmul.f32 %v156_v46, %v75_v59  ;;  %v1550_v14 = vld [vmem:[#allocation16_spill] sm:$0xff] }
 0x10a   :  { %v882_v6 = vsel %vm824_vm7, %v881_v2, %v880_v56  ;;  %v892_v33 = vsel %vm818_vm5, %v891_v42, %v890_v25  ;;  %v221_v32 = vmul.f32 %v156_v46, %v76_v31  ;;  %v222_v48 = vmul.f32 %v156_v46, %v77_v49  ;;  %v1548_v2 = vld [vmem:[#allocation26_spill] sm:$0xff] }
 0x10b   :  { %v1542_v61 = vrot.slane %v1200_v47, 1  ;;  %v894_v9 = vsel %vm821_vm6, %v893_v60, %v892_v33  ;;  %v223_v8 = vmul.f32 %v156_v46, %v78_v12  ;;  %v224_v54 = vmul.f32 %v156_v46, %v79_v23  ;;  %v1544_v47 = vld [vmem:[#allocation22_spill] sm:$0xff] }
 0x10c   :  { %v896_v24 = vsel %vm824_vm7, %v895_v53, %v894_v9  ;;  %v525_v36 = vrot.slane %v219_v63, 4  ;;  %v531_v22 = vrot.slane %v220_v10, 4  ;;  %v537_v58 = vrot.slane %v221_v32, 4 }
 0x10d   :  { %v884_v20 = vsel %vm827_vm8, %v1542_v61, %v882_v6  ;;  %v1543_v3 = vrot.slane %v1202_v51, 1  ;;  %v543_v37 = vrot.slane %v222_v48, 4  ;;  %v549_v18 = vrot.slane %v223_v8, 4  ;;  %v86_v6 = vld [vmem:[#allocation2 + $0x1e0] sm:$0xff]  ;;  %v88_v61 = vld [vmem:[#allocation2 + $0x1f0] sm:$0xff] }
 0x10e   :  { %939 = vst [vmem:[#allocation5 + $0x20] sm:$0xff] %v884_v20  ;;  %v555_v29 = vrot.slane %v224_v54, 4  ;;  %v565_v45 = vrot.slane %v1544_v47, 1  ;;  %v526_v30 = vadd.f32 %v525_v36, %v219_v63  ;;  %v532_v43 = vadd.f32 %v531_v22, %v220_v10  ;;  %v170_v10 = vpop.permute.xlu0 %169  ;;  %v90_v36 = vld [vmem:[#allocation2 + $0x200] sm:$0xff]  ;;  %v91_v22 = vld [vmem:[#allocation2 + $0x208] sm:$0xff] }
 0x10f   :  { %v898_v15 = vsel %vm827_vm8, %v1543_v3, %v896_v24  ;;  %v538_v26 = vadd.f32 %v537_v58, %v221_v32  ;;  %v571_v62 = vrot.slane %v1545_v40, 1  ;;  %v544_v55 = vadd.f32 %v543_v37, %v222_v48  ;;  %v87_v48 = vld [vmem:[#allocation2 + $0x1e8] sm:$0xff]  ;;  %v89_v24 = vld [vmem:[#allocation2 + $0x1f8] sm:$0xff] }
 0x110   :  { %940 = vst [vmem:[#allocation5 + $0x28] sm:$0xff] %v898_v15  ;;  %v550_v4 = vadd.f32 %v549_v18, %v223_v8  ;;  %v556_v28 = vadd.f32 %v555_v29, %v224_v54  ;;  %v577_v35 = vrot.slane %v1546_v1, 1  ;;  %v527_v34 = vrot.slane %v526_v30, 2 }
 0x111   :  { %v533_v51 = vrot.slane %v532_v43, 2  ;;  %v539_v39 = vrot.slane %v538_v26, 2  ;;  %v583_v0 = vrot.slane %v1547_v19, 1  ;;  %v545_v11 = vrot.slane %v544_v55, 2 }
 0x112   :  { %v551_v41 = vrot.slane %v550_v4, 2  ;;  %v589_v44 = vrot.slane %v1548_v2, 1  ;;  %v595_v57 = vrot.slane %v1549_v13, 1  ;;  %v528_v5 = vadd.f32 %v527_v34, %v526_v30 }
 0x113   :  { %v557_v17 = vrot.slane %v556_v28, 2  ;;  %v566_v46 = vadd.f32 %v565_v45, %v1544_v47  ;;  %986 = vrcp.f32 %v1550_v14  ;;  %v534_v59 = vadd.f32 %v533_v51, %v532_v43 }
 0x114   :  { %v540_v52 = vadd.f32 %v539_v39, %v538_v26  ;;  %v572_v38 = vadd.f32 %v571_v62, %v1545_v40  ;;  %v578_v50 = vadd.f32 %v577_v35, %v1546_v1  ;;  %v653_v27 = vrot.slane %v1550_v14, 2 }
 0x115   :  { %v584_v42 = vadd.f32 %v583_v0, %v1547_v19  ;;  %v546_v31 = vadd.f32 %v545_v11, %v544_v55  ;;  %v552_v49 = vadd.f32 %v551_v41, %v550_v4  ;;  %v1448_v21 = vmul.f32 %v1190_v16, %v566_v46 }
 0x116   :  { %v590_v7 = vadd.f32 %v589_v44, %v1548_v2  ;;  %v529_v60 = vrot.slane %v528_v5, 1  ;;  %v558_v53 = vadd.f32 %v557_v17, %v556_v28  ;;  %v1452_v12 = vmul.f32 %v1190_v16, %v572_v38 }
 0x117   :  { %v596_v23 = vadd.f32 %v595_v57, %v1549_v13  ;;  %v535_v56 = vrot.slane %v534_v59, 1  ;;  %v541_v25 = vrot.slane %v540_v52, 1  ;;  %v1456_v63 = vmul.f32 %v1190_v16, %v578_v50 }
 0x118   :  { %988 = vrcp.f32 %v653_v27  ;;  %v1459_v33 = vmul.f32 %v1190_v16, %v584_v42  ;;  %v1462_v32 = vmul.f32 %v1190_v16, %v590_v7  ;;  %v547_v20 = vrot.slane %v546_v31, 1 }
 0x119   :  { %v553_v9 = vrot.slane %v552_v49, 1  ;;  %v1465_v8 = vmul.f32 %v1190_v16, %v596_v23  ;;  %v899_v54 = vrot.slane %v1448_v21, 7  ;;  %v530_v58 = vadd.f32 %v529_v60, %v528_v5 }
 0x11a   :  { %v559_v3 = vrot.slane %v558_v53, 1  ;;  %v903_v15 = vrot.slane %v1452_v12, 7  ;;  %v231_v37 = vmul.f32 %v170_v10, %v86_v6  ;;  %v536_v18 = vadd.f32 %v535_v56, %v534_v59 }
 0x11b   :  { %v542_v29 = vadd.f32 %v541_v25, %v540_v52  ;;  %v907_v47 = vrot.slane %v1456_v63, 7  ;;  %v232_v45 = vmul.f32 %v170_v10, %v87_v48  ;;  %v233_v30 = vmul.f32 %v170_v10, %v88_v61 }
 0x11c   :  { %v234_v43 = vmul.f32 %v170_v10, %v89_v24  ;;  %v235_v26 = vmul.f32 %v170_v10, %v90_v36  ;;  %v236_v16 = vmul.f32 %v170_v10, %v91_v22  ;;  %v548_v40 = vadd.f32 %v547_v20, %v546_v31 }
 0x11d   :  { %v554_v62 = vadd.f32 %v553_v9, %v552_v49  ;;  %v597_v55 = vrot.slane %v231_v37, 4  ;;  %v603_v4 = vrot.slane %v232_v45, 4  ;;  %v609_v28 = vrot.slane %v233_v30, 4 }
 0x11e   :  { %v615_v1 = vrot.slane %v234_v43, 4  ;;  %v621_v35 = vrot.slane %v235_v26, 4  ;;  %v627_v34 = vrot.slane %v236_v16, 4  ;;  %v560_v51 = vadd.f32 %v559_v3, %v558_v53 }
 0x11f   :  { %v911_v39 = vrot.slane %v1459_v33, 7  ;;  %v598_v19 = vadd.f32 %v597_v55, %v231_v37  ;;  %v604_v0 = vadd.f32 %v603_v4, %v232_v45  ;;  %v610_v41 = vadd.f32 %v609_v28, %v233_v30 }
 0x120   :  { %v987_v11 = vpop.eup %986  ;;  %v616_v2 = vadd.f32 %v615_v1, %v234_v43  ;;  %v622_v44 = vadd.f32 %v621_v35, %v235_v26  ;;  %v628_v13 = vadd.f32 %v627_v34, %v236_v16  ;;  %v915_v27 = vrot.slane %v1462_v32, 7 }
 0x121   :  { %v722_v57 = vmul.f32 %v987_v11, %v530_v58  ;;  %v723_v5 = vmul.f32 %v987_v11, %v536_v18  ;;  %v599_v17 = vrot.slane %v598_v19, 2  ;;  %v605_v46 = vrot.slane %v604_v0, 2 }
 0x122   :  { %v611_v14 = vrot.slane %v610_v41, 2  ;;  %v617_v59 = vrot.slane %v616_v2, 2  ;;  %v623_v52 = vrot.slane %v622_v44, 2  ;;  %v629_v38 = vrot.slane %v628_v13, 2 }
 0x123   :  { %v724_v50 = vmul.f32 %v987_v11, %v542_v29  ;;  %v600_v42 = vadd.f32 %v599_v17, %v598_v19  ;;  %v606_v31 = vadd.f32 %v605_v46, %v604_v0  ;;  %v725_v23 = vmul.f32 %v987_v11, %v548_v40 }
 0x124   :  { %v612_v49 = vadd.f32 %v611_v14, %v610_v41  ;;  %v618_v7 = vadd.f32 %v617_v59, %v616_v2  ;;  %v624_v60 = vadd.f32 %v623_v52, %v622_v44  ;;  %v630_v53 = vadd.f32 %v629_v38, %v628_v13 }
 0x125   :  { %v989_v12 = vpop.eup %988  ;;  %v726_v56 = vmul.f32 %v987_v11, %v554_v62  ;;  %v601_v25 = vrot.slane %v600_v42, 1  ;;  %v607_v10 = vrot.slane %v606_v31, 1  ;;  %v727_v20 = vmul.f32 %v987_v11, %v560_v51 }
 0x126   :  { %v613_v6 = vrot.slane %v612_v49, 1  ;;  %v619_v33 = vrot.slane %v618_v7, 1  ;;  %v625_v48 = vrot.slane %v624_v60, 1  ;;  %v631_v61 = vrot.slane %v630_v53, 1 }
 0x127   :  { %v919_v9 = vrot.slane %v1465_v8, 7  ;;  %v602_v24 = vadd.f32 %v601_v25, %v600_v42  ;;  %v608_v32 = vadd.f32 %v607_v10, %v606_v31  ;;  %v900_v37 = vsel %vm809_vm2, %v899_v54, %v722_v57 }
 0x128   :  { %v614_v36 = vadd.f32 %v613_v6, %v612_v49  ;;  %v620_v22 = vadd.f32 %v619_v33, %v618_v7  ;;  %v626_v58 = vadd.f32 %v625_v48, %v624_v60  ;;  %v632_v3 = vadd.f32 %v631_v61, %v630_v53 }
 0x129   :  { %v904_v18 = vsel %vm809_vm2, %v903_v15, %v723_v5  ;;  %v736_v29 = vmul.f32 %v989_v12, %v602_v24  ;;  %v737_v45 = vmul.f32 %v989_v12, %v608_v32  ;;  %v908_v8 = vsel %vm809_vm2, %v907_v47, %v724_v50 }
 0x12a   :  { %v738_v30 = vmul.f32 %v989_v12, %v614_v36  ;;  %v739_v43 = vmul.f32 %v989_v12, %v620_v22  ;;  %v740_v26 = vmul.f32 %v989_v12, %v626_v58  ;;  %v741_v16 = vmul.f32 %v989_v12, %v632_v3 }
 0x12b   :  { %v912_v40 = vsel %vm809_vm2, %v911_v39, %v725_v23  ;;  %v901_v62 = vrot.slane %v736_v29, 6  ;;  %v905_v21 = vrot.slane %v737_v45, 6  ;;  %v916_v28 = vsel %vm809_vm2, %v915_v27, %v726_v56 }
 0x12c   :  { %v909_v55 = vrot.slane %v738_v30, 6  ;;  %v913_v54 = vrot.slane %v739_v43, 6  ;;  %v917_v4 = vrot.slane %v740_v26, 6  ;;  %v921_v15 = vrot.slane %v741_v16, 6 }
 0x12d   :  { %v920_v1 = vsel %vm809_vm2, %v919_v9, %v727_v20  ;;  %v902_v35 = vsel %vm812_vm3, %v901_v62, %v900_v37  ;;  %v906_v34 = vsel %vm812_vm3, %v905_v21, %v904_v18 }
 0x12e   :  { %v910_v63 = vsel %vm812_vm3, %v909_v55, %v908_v8  ;;  %v914_v47 = vsel %vm812_vm3, %v913_v54, %v912_v40  ;;  %v918_v51 = vsel %vm812_vm3, %v917_v4, %v916_v28  ;;  %v922_v39 = vsel %vm812_vm3, %v921_v15, %v920_v1  ;;  %941 = vst [vmem:[#allocation5 + $0x30] sm:$0x7] %v902_v35 }
 0x12f   :  { %942 = vst [vmem:[#allocation5 + $0x38] sm:$0x7] %v906_v34  ;;  %943 = vst [vmem:[#allocation5 + $0x40] sm:$0x7] %v910_v63 }
 0x130   :  { %944 = vst [vmem:[#allocation5 + $0x48] sm:$0x7] %v914_v47  ;;  %945 = vst [vmem:[#allocation5 + $0x50] sm:$0x7] %v918_v51 }
 0x131   :  { %946 = vst [vmem:[#allocation5 + $0x58] sm:$0x7] %v922_v39 }
 0x132   :  { %1021 = shalt.err (!%p1018_p9)
}
 0x133   :  { %958 = dma.vmem_to_hbm [thread:$0]  %s953_s1, 1536, %s1497_s2, [#allocation4], %s1035_s12, %s1035_s12, %s1036_s13  }
 0x134   :  { %1032 = dma.done.wait [#allocation4], 1536  }
 0x135   :  { %1033 = vsyncadd [#allocation4], 4294965760 }
 0x136   :  { %962 = vsyncpa [#allocation3], 1 }
 0x137   :  { %963 = vsyncpa [#allocation4], 1 }

</bundles_post_ra>
